<compile_context>
chip_gen: v7x
topology: tpu7x:2x2x1
jax: 0.10.0
libtpu: 0.0.40
codegen_flags: <defaults>
</compile_context>

<pallas_src>
import functools

import jax
import jax.numpy as jnp
import numpy as np
from jax.experimental import pallas as pl
from jax.experimental.pallas import tpu as pltpu


def _sinkhorn_kernel(x_ref, o_ref, *, num_iters: int, epsilon: float,
                     approx_recip: bool):
    # Whole [B, K] tile is VMEM-resident; reductions run on the XLU,
    # elementwise math on the VPU, exp (and optionally the reciprocals) on
    # the otherwise idle EUP.  There is no MXU work in this kernel.
    x = x_ref[...].astype(jnp.float32)          # native-dtype DMA, on-chip up-cast
    b, k = x.shape                              # static batch / cluster counts

    recip = functools.partial(pl.reciprocal, approx=approx_recip)

    # logits = logits - logits.max(dim=1, keepdim=True)[0]
    x = x - jnp.max(x, axis=1, keepdims=True)

    # Q = exp(logits / eps) + 1e-6  (single EUP pass), still in [B, K] layout.
    q = jnp.exp(x * (1.0 / epsilon)) + 1e-06

    if num_iters == 0:
        # Degenerate case: only the global normalize + trailing *B survive.
        q = q * (float(b) * (1.0 / jnp.sum(q)))

    # num_iters is a small static Python int -> unrolled loop.
    for it in range(num_iters):
        # Per-cluster mass (reference: Q.sum(dim=1)) -> axis 0 in this layout.
        cs = jnp.sum(q, axis=0, keepdims=True)                 # [1, K]
        if it == 0:
            # Fold the reference's global `Q /= Q.sum()` into this reciprocal:
            #   (cs/S + 1e-6) * K == (cs + 1e-6*S) * K / S
            # so the 1/S cancels and only the epsilon picks up a factor of S.
            # Matches the reference up to normal f32 rounding (few ulps).
            s = jnp.sum(cs)
            rc = recip((cs + 1e-06 * s) * float(k))
        else:
            rc = recip((cs + 1e-06) * float(k))

        # Fused column+row scaling: materialize the column-scaled tile once,
        # reuse it for the per-sample sums and the final write of the step.
        t = q * rc                                             # [B, K]
        rs = jnp.sum(t, axis=1, keepdims=True)                 # [B, 1]
        if it + 1 == num_iters:
            # The reference's final `/ B` cancels against its trailing
            # `Q *= B` (to ~1 ulp when B is not a power of two); both skipped.
            rr = recip(rs + 1e-06)
        else:
            rr = recip((rs + 1e-06) * float(b))
        q = t * rr

    # (return Q.t()) already folded away by the [B, K] layout.
    o_ref[...] = q.astype(o_ref.dtype)


def _vmem_limit_bytes(in_bytes: int, out_bytes: int, tile_f32: int) -> int:
    """Scoped-VMEM request: actual live working set, capped per-generation."""
    # Live set: input + output DMA buffers plus ~3 f32 full-tile temporaries
    # (x, q, t) and a little headroom for Mosaic internal scratch.
    needed = in_bytes + out_bytes + 4 * tile_f32 + (2 << 20)
    try:
        cap = int(0.85 * pltpu.get_tpu_info().vmem_capacity_bytes)
    except Exception:
        cap = 48 * 1024 * 1024   # conservative, v7x-safe fallback
    return int(min(cap, max(needed, 32 * 1024 * 1024)))


def sinkhorn_knopp(logits: jax.Array, num_iters: int = 3, epsilon: float = 0.05,
                   *, approx_reciprocal: bool = False):
    """Pallas TPU implementation of SinkhornKnopp.forward (logits: [B, K]).

    `approx_reciprocal=True` pushes the tiny [1,K]/[B,1] reciprocals onto the
    EUP fast path (free slot-wise); default is exact to stay within 1e-5 of
    the reference.
    """
    B, K = logits.shape
    out_dtype = logits.dtype   # mirror torch (computes in the input dtype);
                               # all in-kernel math is f32.

    kernel = functools.partial(
        _sinkhorn_kernel,
        num_iters=int(num_iters),
        epsilon=float(epsilon),
        approx_recip=bool(approx_reciprocal),
    )

    tile_f32 = B * K * 4
    in_bytes = B * K * jnp.dtype(logits.dtype).itemsize
    out_bytes = B * K * jnp.dtype(out_dtype).itemsize
    vmem_limit = _vmem_limit_bytes(in_bytes, out_bytes, tile_f32)

    # Fully-resident single-tile design; block_shape == full array dims is
    # legal even when (B, K) is unaligned, so there is no pad/slice and no
    # in-kernel masking.
    # TODO(synk): for problems whose working set exceeds the per-core VMEM
    # budget (first hit on v7x, 64 MiB), add a tiled-over-B fallback that
    # streams Q through HBM (2 sweeps per Sinkhorn iteration) and splits the
    # B tiles across both v7x TensorCores, exchanging only the [1, K] partial
    # column sums per iteration.
    return pl.pallas_call(
        kernel,
        out_shape=jax.ShapeDtypeStruct((B, K), out_dtype),
        in_specs=[pl.BlockSpec((B, K), lambda: (0, 0))],
        out_specs=pl.BlockSpec((B, K), lambda: (0, 0)),
        compiler_params=pltpu.CompilerParams(vmem_limit_bytes=vmem_limit),
    )(logits)


def _sinkhorn_ref(logits, num_iters=3, epsilon=0.05):
    """Pure-JAX reference mirroring the torch code (with explicit transpose)."""
    logits = logits.astype(jnp.float32)
    logits = logits - jnp.max(logits, axis=1, keepdims=True)
    Q = jnp.exp(logits / epsilon).T
    Q = Q + 1e-06
    Q = Q / jnp.sum(Q)
    B = Q.shape[1]
    K = Q.shape[0]
    for _ in range(num_iters):
        Q = Q / (jnp.sum(Q, axis=1, keepdims=True) + 1e-06)
        Q = Q / K
        Q = Q / (jnp.sum(Q, axis=0, keepdims=True) + 1e-06)
        Q = Q / B
    Q = Q * B
    return Q.T


if __name__ == "__main__":
    # Small deterministic example: batch=8 samples, K=32 clusters.
    key = jax.random.PRNGKey(0)
    logits = jax.random.normal(key, (8, 32), dtype=jnp.float32)

    out = jax.block_until_ready(sinkhorn_knopp(logits, num_iters=3, epsilon=0.05))
    ref = _sinkhorn_ref(logits, num_iters=3, epsilon=0.05)
    assert out.shape == (8, 32)
    np.testing.assert_allclose(np.asarray(out), np.asarray(ref), rtol=1e-5, atol=1e-6)
    # Rows should each sum to ~1 (soft pseudo-labels).
    np.testing.assert_allclose(np.asarray(out).sum(axis=1), np.ones(8), rtol=1e-4)

    # Unaligned shape exercises the no-pad, full-array-block path.
    logits2 = jax.random.normal(jax.random.PRNGKey(1), (6, 50), dtype=jnp.float32)
    out2 = jax.block_until_ready(sinkhorn_knopp(logits2, num_iters=3, epsilon=0.05))
    ref2 = _sinkhorn_ref(logits2, num_iters=3, epsilon=0.05)
    np.testing.assert_allclose(np.asarray(out2), np.asarray(ref2), rtol=1e-5, atol=1e-6)

    print("KERNEL_OK")
</pallas_src>

<mosaic_0001>
module attributes {stable_mosaic.version = 11 : i64} {
  func.func @_sinkhorn_kernel(%arg0: memref<8x32xf32, #tpu.memory_space<vmem>>, %arg1: memref<8x32xf32, #tpu.memory_space<vmem>>) attributes {dimension_semantics = [], scalar_prefetch = 0 : i64, scratch_operands = 0 : i64, tpu.core_type = #tpu.core_type<tc>} {
    %c0 = arith.constant 0 : index
    %c0_0 = arith.constant 0 : index
    %0 = vector.load %arg0[%c0, %c0_0] : memref<8x32xf32, #tpu.memory_space<vmem>>, vector<8x32xf32>
    %cst = arith.constant dense<0xFF800000> : vector<8xf32>
    %1 = vector.multi_reduction <maximumf>, %0, %cst [1] : vector<8x32xf32> to vector<8xf32>
    %2 = vector.shape_cast %1 : vector<8xf32> to vector<8x1xf32>
    %3 = vector.broadcast %2 : vector<8x1xf32> to vector<8x32xf32>
    %4 = arith.subf %0, %3 : vector<8x32xf32>
    %cst_1 = arith.constant 2.000000e+01 : f32
    %5 = vector.broadcast %cst_1 : f32 to vector<8x32xf32>
    %6 = arith.mulf %4, %5 : vector<8x32xf32>
    %7 = math.exp %6 : vector<8x32xf32>
    %cst_2 = arith.constant 9.99999997E-7 : f32
    %8 = vector.broadcast %cst_2 : f32 to vector<8x32xf32>
    %9 = arith.addf %7, %8 : vector<8x32xf32>
    %cst_3 = arith.constant dense<0.000000e+00> : vector<32xf32>
    %10 = vector.multi_reduction <add>, %9, %cst_3 [0] : vector<8x32xf32> to vector<32xf32>
    %11 = vector.shape_cast %10 : vector<32xf32> to vector<1x32xf32>
    %12 = vector.shape_cast %11 : vector<1x32xf32> to vector<1x1x32xf32>
    %cst_4 = arith.constant dense<0.000000e+00> : vector<1xf32>
    %13 = vector.multi_reduction <add>, %12, %cst_4 [1, 2] : vector<1x1x32xf32> to vector<1xf32>
    %14 = vector.shape_cast %13 : vector<1xf32> to vector<1x1x1xf32>
    %15 = vector.extract %14[0, 0, 0] : f32 from vector<1x1x1xf32>
    %cst_5 = arith.constant 9.99999997E-7 : f32
    %16 = arith.mulf %cst_5, %15 : f32
    %17 = vector.broadcast %16 : f32 to vector<1x32xf32>
    %18 = arith.addf %11, %17 : vector<1x32xf32>
    %cst_6 = arith.constant 3.200000e+01 : f32
    %19 = vector.broadcast %cst_6 : f32 to vector<1x32xf32>
    %20 = arith.mulf %18, %19 : vector<1x32xf32>
    %21 = tpu.reciprocal %20 : vector<1x32xf32> -> vector<1x32xf32>
    %22 = vector.broadcast %21 : vector<1x32xf32> to vector<8x32xf32>
    %23 = arith.mulf %9, %22 : vector<8x32xf32>
    %cst_7 = arith.constant dense<0.000000e+00> : vector<8xf32>
    %24 = vector.multi_reduction <add>, %23, %cst_7 [1] : vector<8x32xf32> to vector<8xf32>
    %25 = vector.shape_cast %24 : vector<8xf32> to vector<8x1xf32>
    %cst_8 = arith.constant 9.99999997E-7 : f32
    %26 = vector.broadcast %cst_8 : f32 to vector<8x1xf32>
    %27 = arith.addf %25, %26 : vector<8x1xf32>
    %cst_9 = arith.constant 8.000000e+00 : f32
    %28 = vector.broadcast %cst_9 : f32 to vector<8x1xf32>
    %29 = arith.mulf %27, %28 : vector<8x1xf32>
    %30 = tpu.reciprocal %29 : vector<8x1xf32> -> vector<8x1xf32>
    %31 = vector.broadcast %30 : vector<8x1xf32> to vector<8x32xf32>
    %32 = arith.mulf %23, %31 : vector<8x32xf32>
    %cst_10 = arith.constant dense<0.000000e+00> : vector<32xf32>
    %33 = vector.multi_reduction <add>, %32, %cst_10 [0] : vector<8x32xf32> to vector<32xf32>
    %34 = vector.shape_cast %33 : vector<32xf32> to vector<1x32xf32>
    %cst_11 = arith.constant 9.99999997E-7 : f32
    %35 = vector.broadcast %cst_11 : f32 to vector<1x32xf32>
    %36 = arith.addf %34, %35 : vector<1x32xf32>
    %cst_12 = arith.constant 3.200000e+01 : f32
    %37 = vector.broadcast %cst_12 : f32 to vector<1x32xf32>
    %38 = arith.mulf %36, %37 : vector<1x32xf32>
    %39 = tpu.reciprocal %38 : vector<1x32xf32> -> vector<1x32xf32>
    %40 = vector.broadcast %39 : vector<1x32xf32> to vector<8x32xf32>
    %41 = arith.mulf %32, %40 : vector<8x32xf32>
    %cst_13 = arith.constant dense<0.000000e+00> : vector<8xf32>
    %42 = vector.multi_reduction <add>, %41, %cst_13 [1] : vector<8x32xf32> to vector<8xf32>
    %43 = vector.shape_cast %42 : vector<8xf32> to vector<8x1xf32>
    %cst_14 = arith.constant 9.99999997E-7 : f32
    %44 = vector.broadcast %cst_14 : f32 to vector<8x1xf32>
    %45 = arith.addf %43, %44 : vector<8x1xf32>
    %cst_15 = arith.constant 8.000000e+00 : f32
    %46 = vector.broadcast %cst_15 : f32 to vector<8x1xf32>
    %47 = arith.mulf %45, %46 : vector<8x1xf32>
    %48 = tpu.reciprocal %47 : vector<8x1xf32> -> vector<8x1xf32>
    %49 = vector.broadcast %48 : vector<8x1xf32> to vector<8x32xf32>
    %50 = arith.mulf %41, %49 : vector<8x32xf32>
    %cst_16 = arith.constant dense<0.000000e+00> : vector<32xf32>
    %51 = vector.multi_reduction <add>, %50, %cst_16 [0] : vector<8x32xf32> to vector<32xf32>
    %52 = vector.shape_cast %51 : vector<32xf32> to vector<1x32xf32>
    %cst_17 = arith.constant 9.99999997E-7 : f32
    %53 = vector.broadcast %cst_17 : f32 to vector<1x32xf32>
    %54 = arith.addf %52, %53 : vector<1x32xf32>
    %cst_18 = arith.constant 3.200000e+01 : f32
    %55 = vector.broadcast %cst_18 : f32 to vector<1x32xf32>
    %56 = arith.mulf %54, %55 : vector<1x32xf32>
    %57 = tpu.reciprocal %56 : vector<1x32xf32> -> vector<1x32xf32>
    %58 = vector.broadcast %57 : vector<1x32xf32> to vector<8x32xf32>
    %59 = arith.mulf %50, %58 : vector<8x32xf32>
    %cst_19 = arith.constant dense<0.000000e+00> : vector<8xf32>
    %60 = vector.multi_reduction <add>, %59, %cst_19 [1] : vector<8x32xf32> to vector<8xf32>
    %61 = vector.shape_cast %60 : vector<8xf32> to vector<8x1xf32>
    %cst_20 = arith.constant 9.99999997E-7 : f32
    %62 = vector.broadcast %cst_20 : f32 to vector<8x1xf32>
    %63 = arith.addf %61, %62 : vector<8x1xf32>
    %64 = tpu.reciprocal %63 : vector<8x1xf32> -> vector<8x1xf32>
    %65 = vector.broadcast %64 : vector<8x1xf32> to vector<8x32xf32>
    %66 = arith.mulf %59, %65 : vector<8x32xf32>
    %c0_21 = arith.constant 0 : index
    %c0_22 = arith.constant 0 : index
    %67 = vector.load %arg1[%c0_21, %c0_22] : memref<8x32xf32, #tpu.memory_space<vmem>>, vector<8x32xf32>
    tpu.vector_store %arg1[%c0_21, %c0_22], %66 {strides = array<i32>} : memref<8x32xf32, #tpu.memory_space<vmem>>, vector<8x32xf32>,
    return
  }
}

</mosaic_0001>

<bundles_post_ra>
// kernel: tpu_custom_call.1
= control target key start
LH: loop header
LB: loop body
LE: loop exit
PB: predicated region body
PF: predicated region fallthrough
CT: control target
= control target key end

     0   :  { %6 = vsyncpa [#allocation3], 0  ;;  %s223_s0 = inlined_call_operand.hbm [shape: f32[8,32], index: 0, kind: input, shape index: {}]   ;;  %s224_s1 = inlined_call_operand.hbm [shape: f32[8,32], index: 1, kind: output, shape index: {}]  }
   0x1   :  { %7 = vsyncpa [#allocation4], 0  ;;  %s179_s6 = smov [#allocation2]   ;;  %s131_s10 = scalar_lea.hbm %s223_s0, 128 }
   0x2   :  { %s14_s7 = sshll.u32 %s179_s6, 4  ;;  %p132_p0 = scmp.ne.s32.totalorder %s223_s0, %s131_s10  ;;  %s15_s7 = int_to_ptr.vmem [resolvable:$true] %s14_s7 }
   0x3   :  { %p135_p1 = scmp.lt.u32.totalorder %s131_s10, %s223_s0 }
   0x5   :  { %p137_p2 = pnand %p135_p1, %p132_p0 }
   0x7   :  { %140 = shalt.err (!%p137_p2)
}
   0x8   :  { %s141_s15 = scalar_lea.vmem %s15_s7, 128  ;;  %p146_p4 = scmp.lt.s32.totalorder %s15_s7, %s15_s7 }
   0x9   :  { %p142_p3 = scmp.ne.s32.totalorder %s15_s7, %s141_s15  ;;  %p147_p5 = scmp.lt.s32.totalorder %s141_s15, %s141_s15 }
   0xb   :  { %p148_p6 = por %p147_p5, %p146_p4 }
   0xd   :  { %p149_p7 = pnand %p148_p6, %p142_p3 }
   0xf   :  { %152 = shalt.err (!%p149_p7)
}
  0x10   :  { %17 = dma.hbm_to_vmem [thread:$0]  %s223_s0, 128, %s15_s7, [#allocation3]  }
  0x11   :  { %175 = dma.done.wait [#allocation3], 128  }
  0x12   :  { %176 = vsyncadd [#allocation3], 4294967168  ;;  %vm22_vm0 = vcmask 261120   ;;  %v21_v0 = vld [vmem:[#allocation2] sm:$0xff]  ;;  %vm38_vm1 = vcmask 253952   ;;  %s180_s19 = smov [#allocation5]  }
  0x13   :  { %v23_v1 = vsel %vm22_vm0, %v21_v0, -inf  ;;  %s104_s20 = sshll.u32 %s180_s19, 4  ;;  %s105_s20 = int_to_ptr.vmem [resolvable:$true] %s104_s20 }
  0x14   :  { %24 = vmax.xlane.f32.xlu0 %v23_v1  ;;  %s153_s21 = scalar_lea.vmem %s105_s20, 128  ;;  %p158_p9 = scmp.lt.s32.totalorder %s105_s20, %s105_s20 }
  0x15   :  { %p154_p8 = scmp.ne.s32.totalorder %s105_s20, %s153_s21  ;;  %p159_p10 = scmp.lt.s32.totalorder %s153_s21, %s153_s21 }
  0x17   :  { %p160_p11 = por %p159_p10, %p158_p9 }
  0x19   :  { %p161_p12 = pnand %p160_p11, %p154_p8 }
  0xa1   :  { %v25_v2 = vpop.xlane.xlu0 %24 }
  0xa2   :  { %v26_v3 = vsub.f32 %v21_v0, %v25_v2 }
  0xa4   :  { %v27_v4 = vmul.f32 20.0, %v26_v3 }
  0xa6   :  { %v28_v5 = vmul.f32 1.442695, %v27_v4 }
  0xa8   :  { %117 = vpow2.f32 %v28_v5 }
  0xb2   :  { %v118_v6 = vpop.eup %117 }
  0xb3   :  { %v30_v7 = vadd.f32 1e-06, %v118_v6 }
  0xb5   :  { %v31_v8 = vsel %vm22_vm0, %v30_v7, 0.0 }
  0xb6   :  { %v32_v9 = vrot.slane %v31_v8, 4 }
  0xb8   :  { %v33_v10 = vadd.f32 %v32_v9, %v31_v8 }
  0xba   :  { %v34_v11 = vrot.slane %v33_v10, 2 }
  0xbc   :  { %v35_v12 = vadd.f32 %v34_v11, %v33_v10 }
  0xbe   :  { %v36_v13 = vrot.slane %v35_v12, 1 }
  0xc0   :  { %v37_v14 = vadd.f32 %v36_v13, %v35_v12 }
  0xc2   :  { %v39_v15 = vsel %vm38_vm1, %v37_v14, 0.0 }
  0xc3   :  { %40 = vadd.xlane.f32.xlu0 %v39_v15 }
 0x150   :  { %v41_v16 = vpop.xlane.xlu0 %40 }
 0x151   :  { %v42_v17 = vrot.slane %v41_v16, 4 }
 0x153   :  { %v43_v18 = vadd.f32 %v42_v17, %v41_v16 }
 0x155   :  { %v44_v19 = vrot.slane %v43_v18, 2 }
 0x157   :  { %v45_v20 = vadd.f32 %v44_v19, %v43_v18 }
 0x159   :  { %v46_v21 = vrot.slane %v45_v20, 1 }
 0x15b   :  { %v47_v22 = vadd.f32 %v46_v21, %v45_v20 }
 0x15d   :  { %113 = vpush %v47_v22 }
 0x18e   :  { %s114_s0 = spop %113 }
 0x18f   :  { %s49_s18 = smul.f32 1e-06, %s114_s0 }
 0x191   :  { %v50_v23 = vstv %s49_s18 }
 0x192   :  { %v51_v24 = vadd.f32 %v50_v23, %v37_v14 }
 0x194   :  { %v52_v25 = vmul.f32 32.0, %v51_v24 }
 0x196   :  { %119 = vrcp.f32 %v52_v25 }
 0x1a0   :  { %v120_v26 = vpop.eup %119 }
 0x1a1   :  { %v54_v27 = vmul.f32 %v120_v26, %v30_v7 }
 0x1a3   :  { %v55_v28 = vsel %vm22_vm0, %v54_v27, 0.0 }
 0x1a4   :  { %56 = vadd.xlane.f32.xlu1 %v55_v28 }
 0x231   :  { %v57_v29 = vpop.xlane.xlu1 %56 }
 0x232   :  { %v58_v30 = vadd.f32 1e-06, %v57_v29 }
 0x234   :  { %v59_v31 = vmul.f32 8.0, %v58_v30 }
 0x236   :  { %121 = vrcp.f32 %v59_v31 }
 0x240   :  { %v122_v32 = vpop.eup %121 }
 0x241   :  { %v61_v33 = vmul.f32 %v122_v32, %v54_v27 }
 0x243   :  { %v62_v34 = vsel %vm22_vm0, %v61_v33, 0.0 }
 0x244   :  { %v63_v35 = vrot.slane %v62_v34, 4 }
 0x246   :  { %v64_v36 = vadd.f32 %v63_v35, %v62_v34 }
 0x248   :  { %v65_v37 = vrot.slane %v64_v36, 2 }
 0x24a   :  { %v66_v38 = vadd.f32 %v65_v37, %v64_v36 }
 0x24c   :  { %v67_v39 = vrot.slane %v66_v38, 1 }
 0x24e   :  { %v68_v40 = vadd.f32 %v67_v39, %v66_v38 }
 0x250   :  { %v69_v41 = vadd.f32 1e-06, %v68_v40 }
 0x252   :  { %v70_v42 = vmul.f32 32.0, %v69_v41 }
 0x254   :  { %123 = vrcp.f32 %v70_v42 }
 0x25e   :  { %v124_v43 = vpop.eup %123 }
 0x25f   :  { %v72_v44 = vmul.f32 %v124_v43, %v61_v33 }
 0x261   :  { %v73_v45 = vsel %vm22_vm0, %v72_v44, 0.0 }
 0x262   :  { %74 = vadd.xlane.f32.xlu1 %v73_v45 }
 0x2ef   :  { %v75_v46 = vpop.xlane.xlu1 %74 }
 0x2f0   :  { %v76_v47 = vadd.f32 1e-06, %v75_v46 }
 0x2f2   :  { %v77_v48 = vmul.f32 8.0, %v76_v47 }
 0x2f4   :  { %125 = vrcp.f32 %v77_v48 }
 0x2fe   :  { %v126_v49 = vpop.eup %125 }
 0x2ff   :  { %v79_v50 = vmul.f32 %v126_v49, %v72_v44 }
 0x301   :  { %v80_v51 = vsel %vm22_vm0, %v79_v50, 0.0 }
 0x302   :  { %v81_v52 = vrot.slane %v80_v51, 4 }
 0x304   :  { %v82_v53 = vadd.f32 %v81_v52, %v80_v51 }
 0x306   :  { %v83_v54 = vrot.slane %v82_v53, 2 }
 0x308   :  { %v84_v55 = vadd.f32 %v83_v54, %v82_v53 }
 0x30a   :  { %v85_v56 = vrot.slane %v84_v55, 1 }
 0x30c   :  { %v86_v57 = vadd.f32 %v85_v56, %v84_v55 }
 0x30e   :  { %v87_v58 = vadd.f32 1e-06, %v86_v57 }
 0x310   :  { %v88_v59 = vmul.f32 32.0, %v87_v58 }
 0x312   :  { %127 = vrcp.f32 %v88_v59 }
 0x31c   :  { %v128_v60 = vpop.eup %127 }
 0x31d   :  { %v90_v61 = vmul.f32 %v128_v60, %v79_v50 }
 0x31f   :  { %v91_v62 = vsel %vm22_vm0, %v90_v61, 0.0 }
 0x320   :  { %92 = vadd.xlane.f32.xlu0 %v91_v62 }
 0x3ad   :  { %v93_v63 = vpop.xlane.xlu0 %92 }
 0x3ae   :  { %v94_v0 = vadd.f32 1e-06, %v93_v63 }
 0x3b0   :  { %129 = vrcp.f32 %v94_v0 }
 0x3ba   :  { %v130_v1 = vpop.eup %129 }
 0x3bb   :  { %v96_v2 = vmul.f32 %v130_v1, %v90_v61 }
 0x3bd   :  { %97 = vst.msk [vmem:[#allocation5] sm:$0xff] %vm22_vm0, %v96_v2 }
 0x3be   :  { %164 = shalt.err (!%p161_p12)
}
 0x3bf   :  { %s165_s24 = scalar_lea.hbm %s224_s1, 128 }
 0x3c0   :  { %p166_p13 = scmp.ne.s32.totalorder %s224_s1, %s165_s24  ;;  %p169_p0 = scmp.lt.u32.totalorder %s165_s24, %s224_s1 }
 0x3c2   :  { %p171_p1 = pnand %p169_p0, %p166_p13 }
 0x3c4   :  { %174 = shalt.err (!%p171_p1)
}
 0x3c5   :  { %107 = dma.vmem_to_hbm [thread:$0]  %s105_s20, 128, %s224_s1, [#allocation4]  }
 0x3c6   :  { %177 = dma.done.wait [#allocation4], 128  }
 0x3c7   :  { %178 = vsyncadd [#allocation4], 4294967168 }
 0x3c8   :  { %111 = vsyncpa [#allocation3], 1 }
 0x3c9   :  { %112 = vsyncpa [#allocation4], 1 }

</bundles_post_ra>
